<compile_context>
chip_gen: v7x
topology: tpu7x:2x2x1
jax: 0.10.0
libtpu: 0.0.40
codegen_flags: <defaults>
</compile_context>

<pallas_src>
import functools

import jax
import jax.numpy as jnp
from jax.experimental import pallas as pl
from jax.experimental.pallas import tpu as pltpu


def _round_up(x, m):
    return (x + m - 1) // m * m


def _cornn_seq_kernel(dt, gamma, epsilon,
                      x_ref, wxT_ref, b_ref, hy0_ref, hz0_ref, wz_ref, wy_ref,
                      hy_ref, hz_ref):
    """One time step of the fused recurrence.

    Grid = (batch_blocks, T).  hy_ref / hz_ref have a constant block index over the
    time axis, so they persist in VMEM across t and carry the recurrent state.
    """
    t = pl.program_id(1)

    @pl.when(t == 0)
    def _():
        hy_ref[...] = hy0_ref[...]
        hz_ref[...] = hz0_ref[...]

    # MXU matmul (f32 accumulate), bias broadcast from a (1, Hp) row.
    pre = jnp.dot(x_ref[0], wxT_ref[...],
                  preferred_element_type=jnp.float32) + b_ref[...]

    wz = wz_ref[0, 0]
    wy = wy_ref[0, 0]
    hy = hy_ref[...]
    hz = hz_ref[...]

    # EUP tanh + VPU FMA chain, all in f32 (safe on v5e which has no bf16 VPU/EUP).
    hz_new = hz + dt * (jnp.tanh(pre + wz * hz + wy * hy)
                        - gamma * hy - epsilon * hz)
    hy_new = hy + dt * hz_new

    hy_ref[...] = hy_new
    hz_ref[...] = hz_new


def cornn_sequence(x_seq, wx, b, hy0, hz0, wz, wy, *,
                   dt, gamma, epsilon,
                   block_b=256, matmul_dtype=jnp.float32):
    """Run the coRNN cell over a whole sequence in a single pallas_call.

    x_seq: (T, B, n_inp)   wx: (n_hid, n_inp)   b: (n_hid,)
    hy0, hz0: (B, n_hid)   wz, wy: scalars
    returns final (hy, hz), each (B, n_hid) f32.
    """
    T, B, n_inp = x_seq.shape
    n_hid = wx.shape[0]
    f32 = jnp.float32

    # Lane-dense / sublane-aligned padded shapes.
    Hp = _round_up(n_hid, 128)
    Kp = _round_up(n_inp, 128)
    Bp = _round_up(B, 8)
    if Bp > block_b:
        bb = block_b
        Bp = _round_up(Bp, bb)
    else:
        bb = Bp
    nb = Bp // bb

    # One-time (per sequence) padding / transpose / cast — amortized over T steps.
    wxT = jnp.zeros((Kp, Hp), f32).at[:n_inp, :n_hid].set(
        jnp.transpose(wx).astype(f32))
    b2 = jnp.zeros((1, Hp), f32).at[0, :n_hid].set(b.astype(f32))
    xp = jnp.zeros((T, Bp, Kp), f32).at[:, :B, :n_inp].set(x_seq.astype(f32))
    hyp = jnp.zeros((Bp, Hp), f32).at[:B, :n_hid].set(hy0.astype(f32))
    hzp = jnp.zeros((Bp, Hp), f32).at[:B, :n_hid].set(hz0.astype(f32))
    wz2 = jnp.asarray(wz, f32).reshape(1, 1)
    wy2 = jnp.asarray(wy, f32).reshape(1, 1)

    if matmul_dtype != jnp.float32:
        # bf16 MXU operands, f32 accumulation (elementwise update stays f32).
        xp = xp.astype(matmul_dtype)
        wxT = wxT.astype(matmul_dtype)

    kernel = functools.partial(_cornn_seq_kernel,
                               float(dt), float(gamma), float(epsilon))

    smem = pl.BlockSpec(memory_space=pltpu.MemorySpace.SMEM)

    hy_out, hz_out = pl.pallas_call(
        kernel,
        out_shape=(jax.ShapeDtypeStruct((Bp, Hp), f32),
                   jax.ShapeDtypeStruct((Bp, Hp), f32)),
        grid=(nb, T),
        in_specs=[
            pl.BlockSpec((1, bb, Kp), lambda bi, t: (t, bi, 0)),   # x[t] tile, streamed
            pl.BlockSpec((Kp, Hp),    lambda bi, t: (0, 0)),       # weights, resident
            pl.BlockSpec((1, Hp),     lambda bi, t: (0, 0)),       # bias, resident
            pl.BlockSpec((bb, Hp),    lambda bi, t: (bi, 0)),      # hy0
            pl.BlockSpec((bb, Hp),    lambda bi, t: (bi, 0)),      # hz0
            smem,                                                   # wz scalar
            smem,                                                   # wy scalar
        ],
        out_specs=(pl.BlockSpec((bb, Hp), lambda bi, t: (bi, 0)),  # hy (accumulator)
                   pl.BlockSpec((bb, Hp), lambda bi, t: (bi, 0))), # hz (accumulator)
        compiler_params=pltpu.CompilerParams(
            dimension_semantics=("parallel", "arbitrary")),
    )(xp, wxT, b2, hyp, hzp, wz2, wy2)

    return hy_out[:B, :n_hid], hz_out[:B, :n_hid]


def cornn_cell(x, wx, b, hy, hz, wz, wy, *, dt, gamma, epsilon):
    """Single coRNNCell.forward step (matches the PyTorch module exactly)."""
    return cornn_sequence(x[None], wx, b, hy, hz, wz, wy,
                          dt=dt, gamma=gamma, epsilon=epsilon)


# ---------------------------------------------------------------------------
# Pure-JAX references
# ---------------------------------------------------------------------------
def cornn_cell_ref(x, wx, b, hy, hz, wz, wy, *, dt, gamma, epsilon):
    pre = x @ wx.T + b
    hz_new = hz + dt * (jnp.tanh(pre + wz * hz + wy * hy)
                        - gamma * hy - epsilon * hz)
    hy_new = hy + dt * hz_new
    return hy_new, hz_new


def cornn_sequence_ref(x_seq, wx, b, hy, hz, wz, wy, *, dt, gamma, epsilon):
    for t in range(x_seq.shape[0]):
        hy, hz = cornn_cell_ref(x_seq[t], wx, b, hy, hz, wz, wy,
                                dt=dt, gamma=gamma, epsilon=epsilon)
    return hy, hz


if __name__ == "__main__":
    # Small shapes consistent with the psMNIST-style cell.
    T, B, n_inp, n_hid = 8, 8, 16, 32
    dt, gamma, epsilon = 0.042, 2.7, 4.7

    key = jax.random.PRNGKey(0)
    kx, kw, kb, khy, khz = jax.random.split(key, 5)

    x_seq = jax.random.normal(kx, (T, B, n_inp), jnp.float32)
    # nn.Linear-style init: U(-1/sqrt(n_inp), 1/sqrt(n_inp)).
    bound = 1.0 / jnp.sqrt(jnp.float32(n_inp))
    wx = jax.random.uniform(kw, (n_hid, n_inp), jnp.float32, -bound, bound)
    b = jax.random.uniform(kb, (n_hid,), jnp.float32, -bound, bound)
    hy0 = jax.random.normal(khy, (B, n_hid), jnp.float32)
    hz0 = jax.random.normal(khz, (B, n_hid), jnp.float32)
    wz = jnp.float32(1.0)   # nn.Parameter(torch.Tensor([1.0]))
    wy = jnp.float32(1.0)

    # Fused multi-step recurrence (the main kernel).
    hy_seq, hz_seq = cornn_sequence(x_seq, wx, b, hy0, hz0, wz, wy,
                                    dt=dt, gamma=gamma, epsilon=epsilon)
    jax.block_until_ready((hy_seq, hz_seq))
    hy_seq_r, hz_seq_r = cornn_sequence_ref(x_seq, wx, b, hy0, hz0, wz, wy,
                                            dt=dt, gamma=gamma, epsilon=epsilon)
    assert jnp.allclose(hy_seq, hy_seq_r, atol=1e-5, rtol=1e-5)
    assert jnp.allclose(hz_seq, hz_seq_r, atol=1e-5, rtol=1e-5)

    # Single-step cell (module forward semantics).
    hy1, hz1 = cornn_cell(x_seq[0], wx, b, hy0, hz0, wz, wy,
                          dt=dt, gamma=gamma, epsilon=epsilon)
    jax.block_until_ready((hy1, hz1))
    hy1_r, hz1_r = cornn_cell_ref(x_seq[0], wx, b, hy0, hz0, wz, wy,
                                  dt=dt, gamma=gamma, epsilon=epsilon)
    assert jnp.allclose(hy1, hy1_r, atol=1e-5, rtol=1e-5)
    assert jnp.allclose(hz1, hz1_r, atol=1e-5, rtol=1e-5)

    print("KERNEL_OK")
</pallas_src>

<mosaic_0001>
module attributes {stable_mosaic.version = 11 : i64} {
  func.func @_cornn_seq_kernel(%arg0: i32, %arg1: i32, %arg2: memref<1x8x128xf32, #tpu.memory_space<vmem>>, %arg3: memref<128x128xf32, #tpu.memory_space<vmem>>, %arg4: memref<1x128xf32, #tpu.memory_space<vmem>>, %arg5: memref<8x128xf32, #tpu.memory_space<vmem>>, %arg6: memref<8x128xf32, #tpu.memory_space<vmem>>, %arg7: memref<1x1xf32, #tpu.memory_space<smem>>, %arg8: memref<1x1xf32, #tpu.memory_space<smem>>, %arg9: memref<8x128xf32, #tpu.memory_space<vmem>>, %arg10: memref<8x128xf32, #tpu.memory_space<vmem>>) attributes {dimension_semantics = [#tpu.dimension_semantics<parallel>, #tpu.dimension_semantics<arbitrary>], iteration_bounds = array<i64: 1, 8>, scalar_prefetch = 0 : i64, scratch_operands = 0 : i64, tpu.core_type = #tpu.core_type<tc>, window_params = [{transform_indices = @transform_0, window_bounds = array<i64: 1, 8, 128>}, {pipeline_mode = #tpu.pipeline_mode<synchronous>, transform_indices = @transform_1, window_bounds = array<i64: 128, 128>}, {pipeline_mode = #tpu.pipeline_mode<synchronous>, transform_indices = @transform_2, window_bounds = array<i64: 1, 128>}, {transform_indices = @transform_3, window_bounds = array<i64: 8, 128>}, {transform_indices = @transform_4, window_bounds = array<i64: 8, 128>}, {transform_indices = @transform_5, window_bounds = array<i64: 1, 1>}, {transform_indices = @transform_6, window_bounds = array<i64: 1, 1>}, {transform_indices = @transform_7, window_bounds = array<i64: 8, 128>}, {transform_indices = @transform_8, window_bounds = array<i64: 8, 128>}]} {
    %c0_i32 = arith.constant 0 : i32
    %0 = arith.cmpi eq, %arg1, %c0_i32 : i32
    %1 = arith.extui %0 : i1 to i32
    %c0_i32_0 = arith.constant 0 : i32
    %2 = arith.cmpi ne, %1, %c0_i32_0 : i32
    scf.if %2 {
      %c0_23 = arith.constant 0 : index
      %c0_24 = arith.constant 0 : index
      %35 = vector.load %arg5[%c0_23, %c0_24] : memref<8x128xf32, #tpu.memory_space<vmem>>, vector<8x128xf32>
      %c0_25 = arith.constant 0 : index
      %c0_26 = arith.constant 0 : index
      %36 = vector.load %arg9[%c0_25, %c0_26] : memref<8x128xf32, #tpu.memory_space<vmem>>, vector<8x128xf32>
      tpu.vector_store %arg9[%c0_25, %c0_26], %35 {strides = array<i32>} : memref<8x128xf32, #tpu.memory_space<vmem>>, vector<8x128xf32>,
      %c0_27 = arith.constant 0 : index
      %c0_28 = arith.constant 0 : index
      %37 = vector.load %arg6[%c0_27, %c0_28] : memref<8x128xf32, #tpu.memory_space<vmem>>, vector<8x128xf32>
      %c0_29 = arith.constant 0 : index
      %c0_30 = arith.constant 0 : index
      %38 = vector.load %arg10[%c0_29, %c0_30] : memref<8x128xf32, #tpu.memory_space<vmem>>, vector<8x128xf32>
      tpu.vector_store %arg10[%c0_29, %c0_30], %37 {strides = array<i32>} : memref<8x128xf32, #tpu.memory_space<vmem>>, vector<8x128xf32>,
    } else {
    }
    %c0 = arith.constant 0 : index
    %c0_1 = arith.constant 0 : index
    %c0_2 = arith.constant 0 : index
    %3 = vector.load %arg2[%c0, %c0_1, %c0_2] : memref<1x8x128xf32, #tpu.memory_space<vmem>>, vector<1x8x128xf32>
    %4 = vector.shape_cast %3 : vector<1x8x128xf32> to vector<8x128xf32>
    %c0_3 = arith.constant 0 : index
    %c0_4 = arith.constant 0 : index
    %5 = vector.load %arg3[%c0_3, %c0_4] : memref<128x128xf32, #tpu.memory_space<vmem>>, vector<128x128xf32>
    %cst = arith.constant dense<0.000000e+00> : vector<8x128xf32>
    %6 = tpu.matmul %4, %5, %cst {dimension_numbers = #tpu.dot_dimension_numbers<[1], [0], [0], [1], [0, 0, 1, 1], [], []>} : vector<8x128xf32>, vector<128x128xf32>, vector<8x128xf32> -> vector<8x128xf32>
    %c0_5 = arith.constant 0 : index
    %c0_6 = arith.constant 0 : index
    %7 = vector.load %arg4[%c0_5, %c0_6] : memref<1x128xf32, #tpu.memory_space<vmem>>, vector<1x128xf32>
    %8 = vector.broadcast %7 : vector<1x128xf32> to vector<8x128xf32>
    %9 = arith.addf %6, %8 : vector<8x128xf32>
    %c0_7 = arith.constant 0 : index
    %c0_8 = arith.constant 0 : index
    %10 = memref.load %arg7[%c0_7, %c0_8] : memref<1x1xf32, #tpu.memory_space<smem>>
    %c0_9 = arith.constant 0 : index
    %c0_10 = arith.constant 0 : index
    %11 = memref.load %arg8[%c0_9, %c0_10] : memref<1x1xf32, #tpu.memory_space<smem>>
    %c0_11 = arith.constant 0 : index
    %c0_12 = arith.constant 0 : index
    %12 = vector.load %arg9[%c0_11, %c0_12] : memref<8x128xf32, #tpu.memory_space<vmem>>, vector<8x128xf32>
    %c0_13 = arith.constant 0 : index
    %c0_14 = arith.constant 0 : index
    %13 = vector.load %arg10[%c0_13, %c0_14] : memref<8x128xf32, #tpu.memory_space<vmem>>, vector<8x128xf32>
    %14 = vector.broadcast %10 : f32 to vector<8x128xf32>
    %15 = arith.mulf %14, %13 : vector<8x128xf32>
    %16 = arith.addf %9, %15 : vector<8x128xf32>
    %17 = vector.broadcast %11 : f32 to vector<8x128xf32>
    %18 = arith.mulf %17, %12 : vector<8x128xf32>
    %19 = arith.addf %16, %18 : vector<8x128xf32>
    %20 = math.tanh %19 : vector<8x128xf32>
    %cst_15 = arith.constant 2.700000e+00 : f32
    %21 = vector.broadcast %cst_15 : f32 to vector<8x128xf32>
    %22 = arith.mulf %21, %12 : vector<8x128xf32>
    %23 = arith.subf %20, %22 : vector<8x128xf32>
    %cst_16 = arith.constant 4.700000e+00 : f32
    %24 = vector.broadcast %cst_16 : f32 to vector<8x128xf32>
    %25 = arith.mulf %24, %13 : vector<8x128xf32>
    %26 = arith.subf %23, %25 : vector<8x128xf32>
    %cst_17 = arith.constant 4.200000e-02 : f32
    %27 = vector.broadcast %cst_17 : f32 to vector<8x128xf32>
    %28 = arith.mulf %27, %26 : vector<8x128xf32>
    %29 = arith.addf %13, %28 : vector<8x128xf32>
    %cst_18 = arith.constant 4.200000e-02 : f32
    %30 = vector.broadcast %cst_18 : f32 to vector<8x128xf32>
    %31 = arith.mulf %30, %29 : vector<8x128xf32>
    %32 = arith.addf %12, %31 : vector<8x128xf32>
    %c0_19 = arith.constant 0 : index
    %c0_20 = arith.constant 0 : index
    %33 = vector.load %arg9[%c0_19, %c0_20] : memref<8x128xf32, #tpu.memory_space<vmem>>, vector<8x128xf32>
    tpu.vector_store %arg9[%c0_19, %c0_20], %32 {strides = array<i32>} : memref<8x128xf32, #tpu.memory_space<vmem>>, vector<8x128xf32>,
    %c0_21 = arith.constant 0 : index
    %c0_22 = arith.constant 0 : index
    %34 = vector.load %arg10[%c0_21, %c0_22] : memref<8x128xf32, #tpu.memory_space<vmem>>, vector<8x128xf32>
    tpu.vector_store %arg10[%c0_21, %c0_22], %29 {strides = array<i32>} : memref<8x128xf32, #tpu.memory_space<vmem>>, vector<8x128xf32>,
    return
  }
  func.func @transform_0(%arg0: i32, %arg1: i32) -> (i32, i32, i32) {
    %c0_i32 = arith.constant 0 : i32
    %c0_i32_0 = arith.constant 0 : i32
    return %arg1, %arg0, %c0_i32 : i32, i32, i32
  }
  func.func @transform_1(%arg0: i32, %arg1: i32) -> (i32, i32) {
    %c0_i32 = arith.constant 0 : i32
    %c0_i32_0 = arith.constant 0 : i32
    %c0_i32_1 = arith.constant 0 : i32
    return %c0_i32, %c0_i32_0 : i32, i32
  }
  func.func @transform_2(%arg0: i32, %arg1: i32) -> (i32, i32) {
    %c0_i32 = arith.constant 0 : i32
    %c0_i32_0 = arith.constant 0 : i32
    %c0_i32_1 = arith.constant 0 : i32
    return %c0_i32, %c0_i32_0 : i32, i32
  }
  func.func @transform_3(%arg0: i32, %arg1: i32) -> (i32, i32) {
    %c0_i32 = arith.constant 0 : i32
    %c0_i32_0 = arith.constant 0 : i32
    return %arg0, %c0_i32 : i32, i32
  }
  func.func @transform_4(%arg0: i32, %arg1: i32) -> (i32, i32) {
    %c0_i32 = arith.constant 0 : i32
    %c0_i32_0 = arith.constant 0 : i32
    return %arg0, %c0_i32 : i32, i32
  }
  func.func @transform_5(%arg0: i32, %arg1: i32) -> (i32, i32) {
    %c0_i32 = arith.constant 0 : i32
    %c0_i32_0 = arith.constant 0 : i32
    %c0_i32_1 = arith.constant 0 : i32
    return %c0_i32, %c0_i32_0 : i32, i32
  }
  func.func @transform_6(%arg0: i32, %arg1: i32) -> (i32, i32) {
    %c0_i32 = arith.constant 0 : i32
    %c0_i32_0 = arith.constant 0 : i32
    %c0_i32_1 = arith.constant 0 : i32
    return %c0_i32, %c0_i32_0 : i32, i32
  }
  func.func @transform_7(%arg0: i32, %arg1: i32) -> (i32, i32) {
    %c0_i32 = arith.constant 0 : i32
    %c0_i32_0 = arith.constant 0 : i32
    return %arg0, %c0_i32 : i32, i32
  }
  func.func @transform_8(%arg0: i32, %arg1: i32) -> (i32, i32) {
    %c0_i32 = arith.constant 0 : i32
    %c0_i32_0 = arith.constant 0 : i32
    return %arg0, %c0_i32 : i32, i32
  }
}

</mosaic_0001>

<bundles_post_ra>
// kernel: tpu_custom_call.1
= control target key start
LH: loop header
LB: loop body
LE: loop exit
PB: predicated region body
PF: predicated region fallthrough
CT: control target
= control target key end

     0   :  { %s1277_s0 = inlined_call_operand.hbm [shape: f32[8,8,128], index: 0, kind: input, shape index: {}]   ;;  %s1278_s1 = inlined_call_operand.hbm [shape: f32[128,128], index: 1, kind: input, shape index: {}]   ;;  %s1279_s2 = inlined_call_operand.vmem [shape: f32[1,128], index: 2, kind: input, shape index: {}]   ;;  %s1280_s3 = inlined_call_operand.vmem [shape: f32[8,128], index: 3, kind: input, shape index: {}]   ;;  %s1281_s4 = inlined_call_operand.vmem [shape: f32[8,128], index: 4, kind: input, shape index: {}]   ;;  %s1282_s5 = inlined_call_operand.<no memory space> [shape: f32[1,1], index: 5, kind: input, shape index: {}]   ;;  %s1283_s6 = inlined_call_operand.<no memory space> [shape: f32[1,1], index: 6, kind: input, shape index: {}]   ;;  %s1284_s7 = inlined_call_operand.hbm [shape: f32[8,128], index: 7, kind: output, shape index: {0}]   ;;  %s1285_s8 = inlined_call_operand.hbm [shape: f32[8,128], index: 8, kind: output, shape index: {1}]  }
   0x1   :  { %14 = sst [smem:[#allocation2]] %s1282_s5 }
   0x2   :  { %15 = sst [smem:[#allocation3]] %s1283_s6 }
   0x3   :  { %16 = vsyncpa [#allocation5], 0 }
   0x4   :  { %18 = vsyncpa [#allocation5 + $0x1], 0 }
   0x5   :  { %19 = vsyncpa [#allocation8], 0 }
   0x6   :  { %20 = vsyncpa [#allocation6], 0 }
   0x7   :  { %21 = vsyncpa [#allocation11], 0  ;;  %s1060_s9 = smov 0   ;;  %s1062_s10 = smov 0  }
   0x8   :  { %s1064_s11 = smov 0   ;;  %s1066_s12 = smov 0  }
   0x9   :  { %s1068_s13 = smov 0   ;;  %s1070_s5 = smov 0  }
   0xa LB: > { %s644_s6 = sadd.s32 4294967295, %s998_s5   ;;  %p61_p0 = scmp.ne.s32.totalorder %s982_s10, %s978_s9  ;;  %s998_s5 = sphi %s1070_s5, %s27_s5   ;;  %s994_s13 = sphi %s1068_s13, %s1303_s13   ;;  %s990_s12 = sphi %s1066_s12, %s1302_s12   ;;  %s986_s11 = sphi %s1064_s11, %s1301_s11   ;;  %s982_s10 = sphi %s1062_s10, %s1300_s10   ;;  %s978_s9 = sphi %s1060_s9, %s1299_s9  }
   0xb   : > { %p1092_p1 = scmp.eq.s32.totalorder %s644_s6, 0  ;;  %p645_p2 = scmp.ge.s32.totalorder %s998_s5, 1 }
   0xc   : > { %p260_p3 = scmp.lt.s32.totalorder %s998_s5, 9  ;;  %s1000_s17 = smov [#allocation7]  }
   0xd   : > { %s1290_s14 = scalar_select %p1092_p1, 1, 0 }
   0xe   : > { %p1100_p4 = por %p1092_p1, %p61_p0  ;;  %p1104_p5 = pnand %p645_p2, %p260_p3 }
   0xf   : > { %s272_s18 = sshll.u32 %s1000_s17, 4  ;;  %s36_s20 = sadd.s32 1, %s994_s13  ;;  %s273_s18 = int_to_ptr.vmem [resolvable:$true] %s272_s18 }
  0x10   : > { %s1291_s15 = scalar_select %p1100_p4, 1, 0 }
  0x11   : > { %s1292_s16 = scalar_select %p1104_p5, 1, 0 }
  0x12   : > { %p753_p6 = pneg %p1104_p5  ;;  %s826_s23 = scalar_lea.hbm %s1278_s1, 2048 }
  0x13   : > { %p827_p8 = scmp.ne.s32.totalorder %s1278_s1, %s826_s23  ;;  %p833_p12 = scmp.lt.u32.totalorder %s826_s23, %s1278_s1 }
  0x14   : > { %p1112_p7 = pnand %p753_p6, %p1092_p1 }
  0x16   : > { %p828_p9 = pneg %p1112_p7 }
  0x18   : > { %p829_p10 = pnand %p828_p9, %p827_p8 }
  0x1a   : > { %p830_p11 = pneg %p829_p10 }
  0x1c   : > { %p835_p13 = pnand %p833_p12, %p830_p11 }
  0x1e   : > { %838 = shalt.err (!%p835_p13)
}
  0x1f   : > { %s839_s28 = scalar_lea.vmem %s273_s18, 2048  ;;  %p847_p6 = scmp.lt.s32.totalorder %s273_s18, %s273_s18 }
  0x20   : > { %p840_p0 = scmp.ne.s32.totalorder %s273_s18, %s839_s28  ;;  %p848_p1 = scmp.lt.s32.totalorder %s839_s28, %s839_s28 }
  0x22   : > { %p842_p2 = pnand %p840_p0, %p828_p9  ;;  %p849_p4 = por %p848_p1, %p847_p6 }
  0x24   : > { %p843_p3 = pneg %p842_p2 }
  0x26   : > { %p850_p5 = pnand %p849_p4, %p843_p3 }
  0x28   : > { %853 = shalt.err (!%p850_p5)
}
  0x29   : > { %s1001_s29 = smov 128   ;;  %s1002_s30 = smov 8  }
  0x2a   : > { %756 = dma.hbm_to_vmem [thread:$0]  (!%p1112_p7), %s1278_s1, 2048, %s273_s18, [#allocation8], %s1001_s29, %s1001_s29, %s1002_s30  }
  0x2b   : > { %p37_p1 = scmp.ge.s32.totalorder %s36_s20, 8  ;;  %s48_s21 = sadd.s32 1, %s986_s11 }
  0x2c   : > { %p55_p4 = scmp.ne.s32.totalorder %s986_s11, %s982_s10  ;;  %p56_p5 = scmp.eq.s32.totalorder %s998_s5, 0 }
  0x2d   : > { %s1305_s20 = smov (%p37_p1, %s36_s20), 0  ;;  %p762_p9 = scmp.lt.s32.totalorder %s998_s5, 8 }
  0x2e   : > { %p57_p8 = por %p56_p5, %p55_p4  ;;  %s43_s22 = ssub.s32 %s994_s13, %s1305_s20 }
  0x2f   : > { %s309_s23 = sand.u32 1, %s986_s11   ;;  %p46_p10 = scmp.eq.s32.totalorder %s43_s22, 0 }
  0x30   : > { %s650_s24 = sshll.u32 %s309_s23, 3  ;;  %s651_s25 = sshll.u32 %s994_s13, 7 }
  0x31   : > { %s1145_s26 = scalar_select %p46_p10, %s986_s11, %s48_s21  }
  0x32   : > { %s1150_s18 = scalar_lea.hbm %s1277_s0, %s651_s25  ;;  %s313_s28 = scalar_lea.vmem [#allocation4], %s650_s24 }
  0x33   : > { %s321_s29 = sshll.u32 %s313_s28, 4  ;;  %p1152_p7 = pnand %p762_p9, %p57_p8  ;;  %s1156_s29 = int_to_ptr.vmem [resolvable:$true] %s321_s29 }
  0x34   : > { %s310_s9 = scalar_lea.sflag [#allocation5], %s309_s23  ;;  %s854_s17 = scalar_lea.hbm %s1150_s18, 128 }
  0x35   : > { %p855_p11 = scmp.ne.s32.totalorder %s1150_s18, %s854_s17  ;;  %p856_p12 = pneg %p1152_p7 }
  0x36   : > { %s859_s24 = scalar_lea.hbm %s1277_s0, 1024  ;;  %p860_p2 = scmp.lt.u32.totalorder %s1150_s18, %s1277_s0 }
  0x37   : > { %p857_p13 = pnand %p856_p12, %p855_p11  ;;  %p861_p3 = scmp.lt.u32.totalorder %s859_s24, %s854_s17 }
  0x38   : > { %p863_p1 = scmp.lt.u32.totalorder %s854_s17, %s1150_s18 }
  0x39   : > { %p858_p0 = pneg %p857_p13  ;;  %p862_p6 = por %p861_p3, %p860_p2 }
  0x3b   : > { %p864_p4 = por %p863_p1, %p862_p6 }
  0x3d   : > { %p865_p5 = pnand %p864_p4, %p858_p0 }
  0x3f   : > { %868 = shalt.err (!%p865_p5)
}
  0x40   : > { %s869_s23 = scalar_lea.vmem %s1156_s29, 128  ;;  %s1003_s27 = smov [#allocation4]  }
  0x41   : > { %p870_p8 = scmp.ne.s32.totalorder %s1156_s29, %s869_s23  ;;  %s874_s28 = sshll.u32 %s1003_s27, 4  ;;  %s875_s28 = int_to_ptr.vmem [resolvable:$false] %s874_s28 }
  0x42   : > { %s876_s21 = scalar_lea.vmem %s875_s28, 256  ;;  %p877_p11 = scmp.lt.s32.totalorder %s1156_s29, %s875_s28 }
  0x43   : > { %p872_p9 = pnand %p870_p8, %p856_p12  ;;  %p878_p13 = scmp.lt.s32.totalorder %s876_s21, %s869_s23 }
  0x45   : > { %p873_p10 = pneg %p872_p9  ;;  %p879_p2 = por %p878_p13, %p877_p11 }
  0x47   : > { %p880_p3 = pnand %p879_p2, %p873_p10 }
  0x49   : > { %883 = shalt.err (!%p880_p3)
}
  0x4a   : > { %760 = dma.hbm_to_vmem [thread:$0]  (!%p1152_p7), %s1150_s18, 128, %s1156_s29, %s310_s9  }
  0x4b   : > { %p1295_p0 = scmp.ne.s32.totalorder %s1292_s16, 0 }
  0x4c   : > { %s332_s17 = sand.u32 (!%p1295_p0), 1, %s982_s10   ;;  %p1296_p12 = scmp.ne.s32.totalorder (!%p1295_p0), %s1291_s15, 0 }
  0x4d   : > { %330 = sbr.rel (%p1295_p0) target bundleno = 406 (0x196), region = 48  ;;  %s1186_s22 = sshll.u32 (!%p1295_p0), %s332_s17, 3 }
  0x4e   : > { %s333_s24 = scalar_lea.sflag (!%p1295_p0), [#allocation5], %s332_s17  ;;  %s336_s25 = scalar_lea.vmem (!%p1295_p0), [#allocation4], %s1186_s22 }
  0x54   : > { %961 = dma.done.wait (%p1296_p12), %s333_s24, 128  }
  0x55   : > { %963 = vsyncadd (%p1296_p12), %s333_s24, 4294967168  ;;  %p1297_p6 = scmp.ne.s32.totalorder %s1290_s14, 0 }
  0x57   : > { %965 = dma.done.wait (%p1297_p6), [#allocation8], 2048  }
  0x58   : > { %967 = vsyncadd (%p1297_p6), [#allocation8], 4294965248  ;;  %p655_p7 = scmp.ne.s32.totalorder %s990_s12, 0 }
  0x59   : > { %v388_v0 = vld [vmem:[%s1280_s3] sm:$0xff] (!%p655_p7) }
  0x5a   : > { %387 = sbr.rel (%p655_p7) target bundleno = 97 (0x61), region = 60  ;;  %v390_v1 = vld [vmem:[%s1281_s4] sm:$0xff] (!%p655_p7)  ;;  %389 = vst [vmem:[#allocation9] sm:$0xff] (!%p655_p7), %v388_v0 }
  0x5b   : > { %391 = vst [vmem:[#allocation10] sm:$0xff] (!%p655_p7), %v390_v1 }
  0x61 PF: > { %v393_v2 = vld [vmem:[#allocation7] sm:$0xff]  ;;  %v394_v3 = vld [vmem:[#allocation7 + $0x8] sm:$0xff]  ;;  %v395_v4 = vld [vmem:[#allocation7 + $0x10] sm:$0xff]  ;;  %v1004_v5 = vmov 0.0|0.0   ;;  %vm1005_vm0 = vmmov 0   ;;  %v1006_v8 = vmov 0.0  }
  0x62   : > { %715 = vmatprep.subr.bf16.mxu0 %v1004_v5  ;;  %v716_v6 = vpack.c.bf16 %v394_v3, %v393_v2  ;;  %v396_v7 = vld [vmem:[#allocation7 + $0x18] sm:$0xff]  ;;  %712 = vmatprep.mubr.msk.f32.mxu0 %vm1005_vm0, %v1006_v8  ;;  %v397_v10 = vld [vmem:[#allocation7 + $0x20] sm:$0xff]  ;;  %v398_v11 = vld [vmem:[#allocation7 + $0x28] sm:$0xff]  ;;  %s486_s12 = sld [smem:[#allocation2]]  ;;  %s1007_s19 = smov [#allocation10]  }
  0x63   : > { %v719_v9 = vpack.c.bf16 %v396_v7, %v395_v4  ;;  %v722_v12 = vpack.c.bf16 %v398_v11, %v397_v10  ;;  %v399_v13 = vld [vmem:[#allocation7 + $0x30] sm:$0xff]  ;;  %v400_v14 = vld [vmem:[#allocation7 + $0x38] sm:$0xff]  ;;  %v401_v16 = vld [vmem:[#allocation7 + $0x40] sm:$0xff]  ;;  %s487_s14 = sld [smem:[#allocation3]]  ;;  %s529_s23 = sshll.u32 %s1007_s19, 4  ;;  %s530_s23 = int_to_ptr.vmem [resolvable:$true] %s529_s23 }
  0x64   : > { %717 = vmatpush3.bf16.msra.mxu0 %v716_v6  ;;  %v725_v15 = vpack.c.bf16 %v400_v14, %v399_v13  ;;  %v402_v17 = vld [vmem:[#allocation7 + $0x48] sm:$0xff]  ;;  %v403_v19 = vld [vmem:[#allocation7 + $0x50] sm:$0xff]  ;;  %v404_v20 = vld [vmem:[#allocation7 + $0x58] sm:$0xff]  ;;  %p1211_p1 = scmp.eq.s32.totalorder %s644_s6, 7  ;;  %s1008_s28 = smov [#allocation9]  }
  0x65   : > { %718 = vmatprep.subr.bf16.mxu0 %v1004_v5  ;;  %v728_v18 = vpack.c.bf16 %v402_v17, %v401_v16  ;;  %v731_v21 = vpack.c.bf16 %v404_v20, %v403_v19  ;;  %v405_v22 = vld [vmem:[#allocation7 + $0x60] sm:$0xff]  ;;  %v406_v23 = vld [vmem:[#allocation7 + $0x68] sm:$0xff]  ;;  %v407_v25 = vld [vmem:[#allocation7 + $0x70] sm:$0xff]  ;;  %s516_s21 = sshll.u32 %s1008_s28, 4  ;;  %s884_s17 = scalar_lea.vmem %s530_s23, 128  ;;  %s517_s21 = int_to_ptr.vmem [resolvable:$true] %s516_s21 }
  0x66   : > { %v734_v24 = vpack.c.bf16 %v406_v23, %v405_v22  ;;  %v408_v26 = vld [vmem:[#allocation7 + $0x78] sm:$0xff]  ;;  %v489_v29 = vld [vmem:[#allocation10] sm:$0xff]  ;;  %v656_v31 = vld [vmem:[%s1279_s2] ss:$0 sm:$0xff]  ;;  %p885_p4 = scmp.ne.s32.totalorder %s530_s23, %s884_s17  ;;  %p891_p9 = scmp.lt.s32.totalorder %s530_s23, %s530_s23 }
  0x67   : > { %v737_v27 = vpack.c.bf16 %v408_v26, %v407_v25  ;;  %v392_v28 = vld [vmem:[%s336_s25] sm:$0xff]  ;;  %v488_v32 = vld [vmem:[#allocation9] sm:$0xff]  ;;  %v499_v42 = vmul.f32 4.7, %v489_v29  ;;  %p892_p10 = scmp.lt.s32.totalorder %s884_s17, %s884_s17 }
  0x68   : > { %720 = vmatpush3.bf16.msra.mxu0 %v719_v9  ;;  %v490_v30 = vstv %s486_s12  ;;  %v497_v41 = vmul.f32 2.7, %v488_v32  ;;  %p886_p5 = pnand %p885_p4, %p1211_p1 }
  0x69   : > { %721 = vmatprep.subr.bf16.mxu0 %v1004_v5  ;;  %v493_v33 = vstv %s487_s14  ;;  %v491_v34 = vmul.f32 %v490_v30, %v489_v29  ;;  %p893_p11 = por %p892_p10, %p891_p9 }
  0x6a   : > { %v494_v37 = vmul.f32 %v493_v33, %v488_v32  ;;  %p887_p8 = pneg %p886_p5 }
  0x6c   : > { %723 = vmatpush3.bf16.msra.mxu0 %v722_v12  ;;  %p894_p13 = pnand %p893_p11, %p887_p8 }
  0x6d   : > { %724 = vmatprep.subr.bf16.mxu0 %v1004_v5 }
  0x70   : > { %726 = vmatpush3.bf16.msra.mxu0 %v725_v15 }
  0x71   : > { %727 = vmatprep.subr.bf16.mxu0 %v1004_v5 }
  0x74   : > { %729 = vmatpush3.bf16.msra.mxu0 %v728_v18 }
  0x75   : > { %730 = vmatprep.subr.bf16.mxu0 %v1004_v5 }
  0x78   : > { %732 = vmatpush3.bf16.msra.mxu0 %v731_v21 }
  0x79   : > { %733 = vmatprep.subr.bf16.mxu0 %v1004_v5 }
  0x7c   : > { %735 = vmatpush3.bf16.msra.mxu0 %v734_v24 }
  0x7d   : > { %736 = vmatprep.subr.bf16.mxu0 %v1004_v5 }
  0x80   : > { %738 = vmatpush3.bf16.msra.mxu0 %v737_v27 }
  0x83   : > { %713 = vmatmul.mubr.f32.vlgmr.msra.gmra.mrb[0].mxu0 %v392_v28 }
 0x156   : > { %v482_v35 = vpop.f32.mrb[0].mxu0 }
 0x157   : > { %v483_v36 = vadd.f32 %v656_v31, %v482_v35  ;;  %v714_v38 = vpop.f32.mrb[1].mxu0 }
 0x159   : > { %v492_v39 = vadd.f32 %v491_v34, %v483_v36 }
 0x15b   : > { %v495_v40 = vadd.f32 %v494_v37, %v492_v39 }
 0x15d   : > { %824 = vtanh.f32 %v495_v40 }
 0x167   : > { %v825_v43 = vpop.eup %824 }
 0x168   : > { %v498_v44 = vsub.f32 %v825_v43, %v497_v41 }
 0x16a   : > { %v500_v45 = vsub.f32 %v498_v44, %v499_v42 }
 0x16c   : > { %v501_v46 = vmul.f32 0.042, %v500_v45 }
 0x16e   : > { %v502_v47 = vadd.f32 %v501_v46, %v489_v29 }
 0x170   : > { %v503_v48 = vmul.f32 0.042, %v502_v47  ;;  %506 = vst [vmem:[#allocation10] sm:$0xff] %v502_v47 }
 0x171   : > { %897 = shalt.err (!%p894_p13)
}
 0x172   : > { %s898_s24 = scalar_lea.hbm %s1285_s8, 128 }
 0x173   : > { %p899_p2 = scmp.ne.s32.totalorder %s1285_s8, %s898_s24  ;;  %p904_p12 = scmp.lt.u32.totalorder %s898_s24, %s1285_s8 }
 0x175   : > { %p900_p3 = pnand %p899_p2, %p1211_p1 }
 0x177   : > { %p901_p0 = pneg %p900_p3 }
 0x179   : > { %p906_p6 = pnand %p904_p12, %p901_p0 }
 0x17b   : > { %909 = shalt.err (!%p906_p6)
}
 0x17c   : > { %748 = dma.vmem_to_hbm [thread:$0]  (%p1211_p1), %s530_s23, 128, %s1285_s8, [#allocation11]   ;;  %v504_v49 = vadd.f32 %v503_v48, %v488_v32 }
 0x17d   : > { %s910_s14 = scalar_lea.vmem %s517_s21, 128  ;;  %p917_p8 = scmp.lt.s32.totalorder %s517_s21, %s517_s21 }
 0x17e   : > { %505 = vst [vmem:[#allocation9] sm:$0xff] %v504_v49  ;;  %p911_p7 = scmp.ne.s32.totalorder %s517_s21, %s910_s14  ;;  %p918_p9 = scmp.lt.s32.totalorder %s910_s14, %s910_s14 }
 0x180   : > { %p912_p4 = pnand %p911_p7, %p1211_p1  ;;  %p919_p10 = por %p918_p9, %p917_p8 }
 0x182   : > { %p913_p5 = pneg %p912_p4 }
 0x184   : > { %p920_p11 = pnand %p919_p10, %p913_p5 }
 0x186   : > { %923 = shalt.err (!%p920_p11)
}
 0x187   : > { %s924_s19 = scalar_lea.hbm %s1284_s7, 128 }
 0x188   : > { %p925_p13 = scmp.ne.s32.totalorder %s1284_s7, %s924_s19  ;;  %p930_p0 = scmp.lt.u32.totalorder %s924_s19, %s1284_s7 }
 0x18a   : > { %p926_p2 = pnand %p925_p13, %p1211_p1 }
 0x18c   : > { %p927_p3 = pneg %p926_p2 }
 0x18e   : > { %p932_p12 = pnand %p930_p0, %p927_p3 }
 0x190   : > { %935 = shalt.err (!%p932_p12)
}
 0x191   : > { %746 = dma.vmem_to_hbm [thread:$0]  (%p1211_p1), %s517_s21, 128, %s1284_s7, [#allocation6]  }
 0x192   : > { %969 = dma.done.wait (%p1211_p1), [#allocation6], 128  }
 0x193   : > { %971 = vsyncadd (%p1211_p1), [#allocation6], 4294967168 }
 0x194   : > { %973 = dma.done.wait (%p1211_p1), [#allocation11], 128  }
 0x195   : > { %975 = vsyncadd (%p1211_p1), [#allocation11], 4294967168 }
 0x196 PF: > { %s27_s5 = sadd.s32 1, %s998_s5   ;;  %s1299_s9 = smov %s982_s10 }
 0x197   : > { %p24_p6 = scmp.ge.s32.totalorder %s27_s5, 10   ;;  %s1300_s10 = smov %s986_s11 }
 0x198   : > { %s1301_s11 = smov %s1145_s26  ;;  %s1302_s12 = smov %s994_s13 }
 0x199   : > { %s1303_s13 = smov %s1305_s20  ;;  %26 = sbr.rel (!%p24_p6) target bundleno = 10 (0xa), region = 109 }
 0x1a0   :  { %546 = vsyncpa [#allocation5], 1 }
 0x1a1   :  { %548 = vsyncpa [#allocation5 + $0x1], 1 }
 0x1a2   :  { %549 = vsyncpa [#allocation8], 1 }
 0x1a3   :  { %550 = vsyncpa [#allocation6], 1 }
 0x1a4   :  { %552 = vsyncpa [#allocation6 + $0x1], 1 }
 0x1a5   :  { %553 = vsyncpa [#allocation11], 1 }

</bundles_post_ra>
